<compile_context>
chip_gen: v7x
topology: tpu7x:2x2x1
jax: 0.10.0
libtpu: 0.0.40
codegen_flags: <defaults>
</compile_context>

<pallas_src>
import math

import jax
import jax.numpy as jnp
import numpy as np
from jax.experimental import pallas as pl
from jax.experimental.pallas import tpu as pltpu


def _round_up(n, m):
    return ((n + m - 1) // m) * m


def _device_kind():
    try:
        return jax.devices()[0].device_kind.lower()
    except Exception:
        return ""


def _tensorcores_per_chip():
    # v7x has 2 TensorCores that shard a "parallel" grid axis; v5e/v6e have 1, where
    # the grid is a serial loop and splitting a small batch is pure overhead.
    kind = _device_kind()
    return 2 if ("v7" in kind or "tpu7" in kind) else 1


def _lane_granularity(dim):
    # v6e/v7x MXUs are 256x256: pad large feature dims to 256 so matmuls fill the
    # array.  v5e's 128x128 MXUs (and dims <= 128) stay at 128 granularity.
    kind = _device_kind()
    big_mxu = ("v6" in kind) or ("v7" in kind) or ("tpu7" in kind)
    return 256 if (big_mxu and dim > 128) else 128


# --------------------------------------------------------------------------------------
# Weight preprocessing (computed once, cached across forward calls).
# --------------------------------------------------------------------------------------
def prepare_params(params):
    """Pad / transpose / scale the weights once; reuse the result across forward calls."""
    f32 = jnp.float32
    w1, b1, w2, b2 = params["w1"], params["b1"], params["w2"], params["b2"]
    H, F = w1.shape
    O = w2.shape[0]
    s1 = 1.0 / math.sqrt(F)   # fc1 w_scale
    s2 = 1.0 / math.sqrt(H)   # fc2 w_scale
    bs1 = 1.0
    bs2 = 1.0

    F_pad = _round_up(F, 128)
    H_pad = _round_up(H, _lane_granularity(H))
    O_pad = _round_up(O, _lane_granularity(O))

    def pad2(a, r, c):
        a = a.astype(f32)
        return jnp.pad(a, ((0, r - a.shape[0]), (0, c - a.shape[1])))

    prepared = {
        "w1t_s": pad2(w1.T.astype(f32) * s1, F_pad, H_pad),                     # (Fp, Hp)
        "w1ta_half": pad2(jnp.abs(w1).T.astype(f32) * (s1 * 0.5), F_pad, H_pad),
        "b1s": jnp.pad((b1.astype(f32) * bs1).reshape(1, H), ((0, 0), (0, H_pad - H))),
        "w2t_s": pad2(w2.T.astype(f32) * s2, H_pad, O_pad),                     # (Hp, Op)
        "w2p": pad2(w2.astype(f32), O_pad, H_pad),                              # (Op, Hp) unscaled
        "b2s": jnp.pad((b2.astype(f32) * bs2).reshape(1, O), ((0, 0), (0, O_pad - O))),
    }
    dims = dict(F=F, H=H, O=O, F_pad=F_pad, H_pad=H_pad, O_pad=O_pad, s2=s2)
    return prepared, dims


# --------------------------------------------------------------------------------------
# Kernel
# --------------------------------------------------------------------------------------
def _make_kernel(o_actual, half_s2):
    """o_actual = real (unpadded) number of classes; half_s2 = fc2 w_scale / 2."""
    unroll = o_actual <= 16   # small O: full unroll for LLO scheduling; large O: rolled loop

    def kernel(tg_ref, xin_ref, w1t_ref, w1ta_ref, b1_ref,
               w2t_ref, w2p_ref, b2_ref, y_ref, res_ref):
        f32 = jnp.float32
        tg = tg_ref[...]                    # (TB, 1) int32
        b1s = b1_ref[...]                   # (1, Hp)   b1 * b_scale
        b2s = b2_ref[...]                   # (1, Op)   b2 * b_scale

        x = xin_ref[0]                      # (TB, Fp)
        lo = xin_ref[1]
        up = xin_ref[2]

        # ---------------- fc1 : BoundLinear (separate dots, shared resident RHS) -------
        w1t = w1t_ref[...]
        zx = jnp.dot(x, w1t, preferred_element_type=f32)           # x @ W1^T * s1
        zxm = jnp.dot(lo + up, w1t, preferred_element_type=f32)    # (lo+up) @ W1^T * s1
        rr_half = jnp.dot(up - lo, w1ta_ref[...], preferred_element_type=f32)

        # ---------------- BoundTanh ----------------
        y1 = jnp.tanh(zx + b1s)
        xc = zxm * 0.5 + b1s
        lo1 = jnp.tanh(xc - rr_half)
        up1 = jnp.tanh(xc + rr_half)

        # ---------------- fc2 : BoundFinalLinear ----------------
        w2t = w2t_ref[...]
        y_ref[...] = jnp.dot(y1, w2t, preferred_element_type=f32) + b2s   # plain forward

        xm2 = lo1 + up1
        rm2 = up1 - lo1
        z_xm2 = jnp.dot(xm2, w2t, preferred_element_type=f32)             # s2 * (xm2 @ W2^T)

        lane_o = jax.lax.broadcasted_iota(jnp.int32, z_xm2.shape, 1)      # (TB, Op)
        onehot = (tg == lane_o).astype(f32)
        d = jnp.sum(onehot * z_xm2, axis=1, keepdims=True)                # s2 * (xm2 . W2[t])
        bt = jnp.sum(onehot * b2s, axis=1, keepdims=True)                 # bs2 * b2[t]
        term1 = 0.5 * (z_xm2 - d) + (b2s - bt)

        # term2: rv[b, o] = sum_h |W2[o,h] - W2[t_b,h]| * rm2[b,h]   (linear in O).
        # Gather W2[t_b] per row with one small matmul, then loop classes on VPU/XLU.
        w2row = jnp.dot(onehot, w2p_ref[...], preferred_element_type=f32)  # (TB, Hp)

        def body(o, acc):
            w2_o = w2p_ref[pl.ds(o, 1), :]                                 # (1, Hp)
            z = jnp.abs(w2_o - w2row) * rm2                                # VPU abs-diff
            col = jnp.sum(z, axis=1, keepdims=True)                        # XLU lane reduce
            return acc + col * (lane_o == o).astype(f32)

        rv = jax.lax.fori_loop(0, o_actual, body, jnp.zeros_like(z_xm2), unroll=unroll)
        res_ref[...] = term1 + rv * half_s2

    return kernel


# --------------------------------------------------------------------------------------
# Wrapper
# --------------------------------------------------------------------------------------
def predictor_forward(x, lower, upper, targets, prepared, dims, *, tb=None):
    """Bounded forward pass of Predictor; returns (y, res) like the PyTorch module."""
    f32 = jnp.float32
    B, F = x.shape
    assert F == dims["F"]
    F_pad, H_pad, O_pad, O = dims["F_pad"], dims["H_pad"], dims["O_pad"], dims["O"]

    # Batch tile: biggest tile that fits; only force a split on multi-TC chips (v7x).
    ncores = _tensorcores_per_chip()
    if tb is None:
        tb = 256 if B >= 512 else 128
    b_round = _round_up(B, 8)
    tb_eff = min(tb, b_round)
    if ncores >= 2 and b_round // tb_eff < ncores and b_round >= 8 * ncores:
        tb_eff = _round_up(pl.cdiv(b_round, ncores), 8)
    B_pad = _round_up(b_round, tb_eff)
    grid = (B_pad // tb_eff,)

    # Pack x / lower / upper into one slab -> a single input DMA per grid step.
    xin = jnp.stack([x.astype(f32), lower.astype(f32), upper.astype(f32)], axis=0)
    xin = jnp.pad(xin, ((0, 0), (0, B_pad - B), (0, F_pad - F)))
    tgp = jnp.pad(targets.astype(jnp.int32).reshape(B, 1), ((0, B_pad - B), (0, 0)))

    kernel = _make_kernel(O, dims["s2"] * 0.5)

    in_specs = [
        pl.BlockSpec((tb_eff, 1), lambda i: (i, 0)),            # targets
        pl.BlockSpec((3, tb_eff, F_pad), lambda i: (0, i, 0)),  # [x; lower; upper]
        pl.BlockSpec((F_pad, H_pad), lambda i: (0, 0)),         # W1^T * s1
        pl.BlockSpec((F_pad, H_pad), lambda i: (0, 0)),         # |W1|^T * s1/2
        pl.BlockSpec((1, H_pad), lambda i: (0, 0)),             # b1 * bs1
        pl.BlockSpec((H_pad, O_pad), lambda i: (0, 0)),         # W2^T * s2
        pl.BlockSpec((O_pad, H_pad), lambda i: (0, 0)),         # W2 (unscaled)
        pl.BlockSpec((1, O_pad), lambda i: (0, 0)),             # b2 * bs2
    ]
    out_specs = (
        pl.BlockSpec((tb_eff, O_pad), lambda i: (i, 0)),
        pl.BlockSpec((tb_eff, O_pad), lambda i: (i, 0)),
    )
    out_shape = (
        jax.ShapeDtypeStruct((B_pad, O_pad), f32),
        jax.ShapeDtypeStruct((B_pad, O_pad), f32),
    )

    y_pad, res_pad = pl.pallas_call(
        kernel,
        grid=grid,
        in_specs=in_specs,
        out_specs=out_specs,
        out_shape=out_shape,
        compiler_params=pltpu.CompilerParams(
            dimension_semantics=("parallel",),
            vmem_limit_bytes=32 * 1024 * 1024,
        ),
    )(tgp, xin, prepared["w1t_s"], prepared["w1ta_half"], prepared["b1s"],
      prepared["w2t_s"], prepared["w2p"], prepared["b2s"])

    return y_pad[:B, :O], res_pad[:B, :O]


# --------------------------------------------------------------------------------------
# Pure-JAX reference (port of the PyTorch forward) for verification.
# --------------------------------------------------------------------------------------
def predictor_reference(x, lower, upper, targets, params):
    w1, b1, w2, b2 = params["w1"], params["b1"], params["w2"], params["b2"]
    F = x.shape[1]
    H = w1.shape[0]
    s1 = 1.0 / math.sqrt(F)
    s2 = 1.0 / math.sqrt(H)

    # fc1 (BoundLinear)
    y = x @ w1.T * s1 + b1
    xm, rm = lower + upper, upper - lower
    xc = xm @ w1.T * (s1 / 2) + b1
    rr = rm @ jnp.abs(w1).T
    lo, up = xc - rr * (s1 / 2), xc + rr * (s1 / 2)
    # tanh
    y, lo, up = jnp.tanh(y), jnp.tanh(lo), jnp.tanh(up)
    # fc2 (BoundFinalLinear)
    y2 = y @ w2.T * s2 + b2
    w = w2[None, :, :] - w2[targets][:, None, :]            # (B, O, H)
    xm2, rm2 = lo + up, up - lo
    xv = jnp.einsum("boh,bh->bo", w, xm2) * (s2 / 2)
    b = b2 - b2[targets][:, None]
    xv = xv + b
    rv = jnp.einsum("boh,bh->bo", jnp.abs(w), rm2)
    res = xv + rv * (s2 / 2)
    return y2, res


if __name__ == "__main__":
    B, F, H, O = 8, 16, 32, 10

    key = jax.random.PRNGKey(0)
    k_w1, k_w2, k_x, k_r, k_t = jax.random.split(key, 5)

    # Deterministic init matching the module's __init__: weights ~ N(0,1), biases = 0.
    params = {
        "w1": jax.random.normal(k_w1, (H, F), jnp.float32),
        "b1": jnp.zeros((H,), jnp.float32),
        "w2": jax.random.normal(k_w2, (O, H), jnp.float32),
        "b2": jnp.zeros((O,), jnp.float32),
    }

    x = jax.random.normal(k_x, (B, F), jnp.float32)
    eps = jnp.abs(jax.random.normal(k_r, (B, F), jnp.float32)) * 0.1
    lower = x - eps
    upper = x + eps
    targets = jax.random.randint(k_t, (B,), 0, O, jnp.int32)

    prepared, dims = prepare_params(params)   # weight prep computed once, reused per call
    y, res = predictor_forward(x, lower, upper, targets, prepared, dims)
    jax.block_until_ready((y, res))

    y_ref, res_ref = predictor_reference(x, lower, upper, targets, params)
    np.testing.assert_allclose(np.asarray(y), np.asarray(y_ref), rtol=1e-5, atol=2e-5)
    np.testing.assert_allclose(np.asarray(res), np.asarray(res_ref), rtol=1e-5, atol=2e-5)

    print("KERNEL_OK")
</pallas_src>

<mosaic_0001>
module attributes {stable_mosaic.version = 11 : i64} {
  func.func @kernel(%arg0: i32, %arg1: memref<8x1xi32, #tpu.memory_space<vmem>>, %arg2: memref<3x8x128xf32, #tpu.memory_space<vmem>>, %arg3: memref<128x128xf32, #tpu.memory_space<vmem>>, %arg4: memref<128x128xf32, #tpu.memory_space<vmem>>, %arg5: memref<1x128xf32, #tpu.memory_space<vmem>>, %arg6: memref<128x128xf32, #tpu.memory_space<vmem>>, %arg7: memref<128x128xf32, #tpu.memory_space<vmem>>, %arg8: memref<1x128xf32, #tpu.memory_space<vmem>>, %arg9: memref<8x128xf32, #tpu.memory_space<vmem>>, %arg10: memref<8x128xf32, #tpu.memory_space<vmem>>) attributes {dimension_semantics = [#tpu.dimension_semantics<parallel>], iteration_bounds = array<i64: 1>, scalar_prefetch = 0 : i64, scratch_operands = 0 : i64, tpu.core_type = #tpu.core_type<tc>, window_params = [{transform_indices = @transform_0, window_bounds = array<i64: 8, 1>}, {transform_indices = @transform_1, window_bounds = array<i64: 3, 8, 128>}, {pipeline_mode = #tpu.pipeline_mode<synchronous>, transform_indices = @transform_2, window_bounds = array<i64: 128, 128>}, {pipeline_mode = #tpu.pipeline_mode<synchronous>, transform_indices = @transform_3, window_bounds = array<i64: 128, 128>}, {pipeline_mode = #tpu.pipeline_mode<synchronous>, transform_indices = @transform_4, window_bounds = array<i64: 1, 128>}, {pipeline_mode = #tpu.pipeline_mode<synchronous>, transform_indices = @transform_5, window_bounds = array<i64: 128, 128>}, {pipeline_mode = #tpu.pipeline_mode<synchronous>, transform_indices = @transform_6, window_bounds = array<i64: 128, 128>}, {pipeline_mode = #tpu.pipeline_mode<synchronous>, transform_indices = @transform_7, window_bounds = array<i64: 1, 128>}, {transform_indices = @transform_8, window_bounds = array<i64: 8, 128>}, {transform_indices = @transform_9, window_bounds = array<i64: 8, 128>}]} {
    %c0 = arith.constant 0 : index
    %c0_0 = arith.constant 0 : index
    %0 = vector.load %arg1[%c0, %c0_0] : memref<8x1xi32, #tpu.memory_space<vmem>>, vector<8x1xi32>
    %c0_1 = arith.constant 0 : index
    %c0_2 = arith.constant 0 : index
    %1 = vector.load %arg5[%c0_1, %c0_2] : memref<1x128xf32, #tpu.memory_space<vmem>>, vector<1x128xf32>
    %c0_3 = arith.constant 0 : index
    %c0_4 = arith.constant 0 : index
    %2 = vector.load %arg8[%c0_3, %c0_4] : memref<1x128xf32, #tpu.memory_space<vmem>>, vector<1x128xf32>
    %c0_5 = arith.constant 0 : index
    %c0_6 = arith.constant 0 : index
    %c0_7 = arith.constant 0 : index
    %3 = vector.load %arg2[%c0_5, %c0_6, %c0_7] : memref<3x8x128xf32, #tpu.memory_space<vmem>>, vector<1x8x128xf32>
    %4 = vector.shape_cast %3 : vector<1x8x128xf32> to vector<8x128xf32>
    %c1 = arith.constant 1 : index
    %c0_8 = arith.constant 0 : index
    %c0_9 = arith.constant 0 : index
    %5 = vector.load %arg2[%c1, %c0_8, %c0_9] : memref<3x8x128xf32, #tpu.memory_space<vmem>>, vector<1x8x128xf32>
    %6 = vector.shape_cast %5 : vector<1x8x128xf32> to vector<8x128xf32>
    %c2 = arith.constant 2 : index
    %c0_10 = arith.constant 0 : index
    %c0_11 = arith.constant 0 : index
    %7 = vector.load %arg2[%c2, %c0_10, %c0_11] : memref<3x8x128xf32, #tpu.memory_space<vmem>>, vector<1x8x128xf32>
    %8 = vector.shape_cast %7 : vector<1x8x128xf32> to vector<8x128xf32>
    %c0_12 = arith.constant 0 : index
    %c0_13 = arith.constant 0 : index
    %9 = vector.load %arg3[%c0_12, %c0_13] : memref<128x128xf32, #tpu.memory_space<vmem>>, vector<128x128xf32>
    %cst = arith.constant dense<0.000000e+00> : vector<8x128xf32>
    %10 = tpu.matmul %4, %9, %cst {dimension_numbers = #tpu.dot_dimension_numbers<[1], [0], [0], [1], [0, 0, 1, 1], [], []>} : vector<8x128xf32>, vector<128x128xf32>, vector<8x128xf32> -> vector<8x128xf32>
    %11 = arith.addf %6, %8 : vector<8x128xf32>
    %cst_14 = arith.constant dense<0.000000e+00> : vector<8x128xf32>
    %12 = tpu.matmul %11, %9, %cst_14 {dimension_numbers = #tpu.dot_dimension_numbers<[1], [0], [0], [1], [0, 0, 1, 1], [], []>} : vector<8x128xf32>, vector<128x128xf32>, vector<8x128xf32> -> vector<8x128xf32>
    %13 = arith.subf %8, %6 : vector<8x128xf32>
    %c0_15 = arith.constant 0 : index
    %c0_16 = arith.constant 0 : index
    %14 = vector.load %arg4[%c0_15, %c0_16] : memref<128x128xf32, #tpu.memory_space<vmem>>, vector<128x128xf32>
    %cst_17 = arith.constant dense<0.000000e+00> : vector<8x128xf32>
    %15 = tpu.matmul %13, %14, %cst_17 {dimension_numbers = #tpu.dot_dimension_numbers<[1], [0], [0], [1], [0, 0, 1, 1], [], []>} : vector<8x128xf32>, vector<128x128xf32>, vector<8x128xf32> -> vector<8x128xf32>
    %16 = vector.broadcast %1 : vector<1x128xf32> to vector<8x128xf32>
    %17 = arith.addf %10, %16 : vector<8x128xf32>
    %18 = math.tanh %17 : vector<8x128xf32>
    %cst_18 = arith.constant 5.000000e-01 : f32
    %19 = vector.broadcast %cst_18 : f32 to vector<8x128xf32>
    %20 = arith.mulf %12, %19 : vector<8x128xf32>
    %21 = vector.broadcast %1 : vector<1x128xf32> to vector<8x128xf32>
    %22 = arith.addf %20, %21 : vector<8x128xf32>
    %23 = arith.subf %22, %15 : vector<8x128xf32>
    %24 = math.tanh %23 : vector<8x128xf32>
    %25 = arith.addf %22, %15 : vector<8x128xf32>
    %26 = math.tanh %25 : vector<8x128xf32>
    %c0_19 = arith.constant 0 : index
    %c0_20 = arith.constant 0 : index
    %27 = vector.load %arg6[%c0_19, %c0_20] : memref<128x128xf32, #tpu.memory_space<vmem>>, vector<128x128xf32>
    %cst_21 = arith.constant dense<0.000000e+00> : vector<8x128xf32>
    %28 = tpu.matmul %18, %27, %cst_21 {dimension_numbers = #tpu.dot_dimension_numbers<[1], [0], [0], [1], [0, 0, 1, 1], [], []>} : vector<8x128xf32>, vector<128x128xf32>, vector<8x128xf32> -> vector<8x128xf32>
    %29 = vector.broadcast %2 : vector<1x128xf32> to vector<8x128xf32>
    %30 = arith.addf %28, %29 : vector<8x128xf32>
    %c0_22 = arith.constant 0 : index
    %c0_23 = arith.constant 0 : index
    %31 = vector.load %arg9[%c0_22, %c0_23] : memref<8x128xf32, #tpu.memory_space<vmem>>, vector<8x128xf32>
    tpu.vector_store %arg9[%c0_22, %c0_23], %30 {strides = array<i32>} : memref<8x128xf32, #tpu.memory_space<vmem>>, vector<8x128xf32>,
    %32 = arith.addf %24, %26 : vector<8x128xf32>
    %33 = arith.subf %26, %24 : vector<8x128xf32>
    %cst_24 = arith.constant dense<0.000000e+00> : vector<8x128xf32>
    %34 = tpu.matmul %32, %27, %cst_24 {dimension_numbers = #tpu.dot_dimension_numbers<[1], [0], [0], [1], [0, 0, 1, 1], [], []>} : vector<8x128xf32>, vector<128x128xf32>, vector<8x128xf32> -> vector<8x128xf32>
    %35 = tpu.iota {dimensions = array<i32: 1>} : vector<8x128xi32>
    %36 = vector.broadcast %0 : vector<8x1xi32> to vector<8x128xi32>
    %37 = arith.cmpi eq, %36, %35 : vector<8x128xi32>
    %38 = arith.extui %37 : vector<8x128xi1> to vector<8x128xi32>
    %39 = arith.sitofp %38 : vector<8x128xi32> to vector<8x128xf32>
    %40 = arith.mulf %39, %34 : vector<8x128xf32>
    %cst_25 = arith.constant dense<0.000000e+00> : vector<8xf32>
    %41 = vector.multi_reduction <add>, %40, %cst_25 [1] : vector<8x128xf32> to vector<8xf32>
    %42 = vector.shape_cast %41 : vector<8xf32> to vector<8x1xf32>
    %43 = vector.broadcast %2 : vector<1x128xf32> to vector<8x128xf32>
    %44 = arith.mulf %39, %43 : vector<8x128xf32>
    %cst_26 = arith.constant dense<0.000000e+00> : vector<8xf32>
    %45 = vector.multi_reduction <add>, %44, %cst_26 [1] : vector<8x128xf32> to vector<8xf32>
    %46 = vector.shape_cast %45 : vector<8xf32> to vector<8x1xf32>
    %47 = vector.broadcast %42 : vector<8x1xf32> to vector<8x128xf32>
    %48 = arith.subf %34, %47 : vector<8x128xf32>
    %cst_27 = arith.constant 5.000000e-01 : f32
    %49 = vector.broadcast %cst_27 : f32 to vector<8x128xf32>
    %50 = arith.mulf %49, %48 : vector<8x128xf32>
    %51 = vector.broadcast %2 : vector<1x128xf32> to vector<8x128xf32>
    %52 = vector.broadcast %46 : vector<8x1xf32> to vector<8x128xf32>
    %53 = arith.subf %51, %52 : vector<8x128xf32>
    %54 = arith.addf %50, %53 : vector<8x128xf32>
    %c0_28 = arith.constant 0 : index
    %c0_29 = arith.constant 0 : index
    %55 = vector.load %arg7[%c0_28, %c0_29] : memref<128x128xf32, #tpu.memory_space<vmem>>, vector<128x128xf32>
    %cst_30 = arith.constant dense<0.000000e+00> : vector<8x128xf32>
    %56 = tpu.matmul %39, %55, %cst_30 {dimension_numbers = #tpu.dot_dimension_numbers<[1], [0], [0], [1], [0, 0, 1, 1], [], []>} : vector<8x128xf32>, vector<128x128xf32>, vector<8x128xf32> -> vector<8x128xf32>
    %cst_31 = arith.constant 0.000000e+00 : f32
    %57 = vector.broadcast %cst_31 : f32 to vector<8x128xf32>
    %c0_i32 = arith.constant 0 : i32
    %58 = arith.index_cast %c0_i32 : i32 to index
    %c0_32 = arith.constant 0 : index
    %59 = vector.load %arg7[%58, %c0_32] : memref<128x128xf32, #tpu.memory_space<vmem>>, vector<1x128xf32>
    %60 = vector.broadcast %59 : vector<1x128xf32> to vector<8x128xf32>
    %61 = arith.subf %60, %56 : vector<8x128xf32>
    %62 = math.absf %61 : vector<8x128xf32>
    %63 = arith.mulf %62, %33 : vector<8x128xf32>
    %cst_33 = arith.constant dense<0.000000e+00> : vector<8xf32>
    %64 = vector.multi_reduction <add>, %63, %cst_33 [1] : vector<8x128xf32> to vector<8xf32>
    %65 = vector.shape_cast %64 : vector<8xf32> to vector<8x1xf32>
    %66 = vector.broadcast %c0_i32 : i32 to vector<8x128xi32>
    %67 = arith.cmpi eq, %35, %66 : vector<8x128xi32>
    %68 = arith.extui %67 : vector<8x128xi1> to vector<8x128xi32>
    %69 = arith.sitofp %68 : vector<8x128xi32> to vector<8x128xf32>
    %70 = vector.broadcast %65 : vector<8x1xf32> to vector<8x128xf32>
    %71 = arith.mulf %70, %69 : vector<8x128xf32>
    %72 = arith.addf %57, %71 : vector<8x128xf32>
    %c1_i32 = arith.constant 1 : i32
    %73 = arith.index_cast %c1_i32 : i32 to index
    %c0_34 = arith.constant 0 : index
    %74 = vector.load %arg7[%73, %c0_34] : memref<128x128xf32, #tpu.memory_space<vmem>>, vector<1x128xf32>
    %75 = vector.broadcast %74 : vector<1x128xf32> to vector<8x128xf32>
    %76 = arith.subf %75, %56 : vector<8x128xf32>
    %77 = math.absf %76 : vector<8x128xf32>
    %78 = arith.mulf %77, %33 : vector<8x128xf32>
    %cst_35 = arith.constant dense<0.000000e+00> : vector<8xf32>
    %79 = vector.multi_reduction <add>, %78, %cst_35 [1] : vector<8x128xf32> to vector<8xf32>
    %80 = vector.shape_cast %79 : vector<8xf32> to vector<8x1xf32>
    %81 = vector.broadcast %c1_i32 : i32 to vector<8x128xi32>
    %82 = arith.cmpi eq, %35, %81 : vector<8x128xi32>
    %83 = arith.extui %82 : vector<8x128xi1> to vector<8x128xi32>
    %84 = arith.sitofp %83 : vector<8x128xi32> to vector<8x128xf32>
    %85 = vector.broadcast %80 : vector<8x1xf32> to vector<8x128xf32>
    %86 = arith.mulf %85, %84 : vector<8x128xf32>
    %87 = arith.addf %72, %86 : vector<8x128xf32>
    %c2_i32 = arith.constant 2 : i32
    %88 = arith.index_cast %c2_i32 : i32 to index
    %c0_36 = arith.constant 0 : index
    %89 = vector.load %arg7[%88, %c0_36] : memref<128x128xf32, #tpu.memory_space<vmem>>, vector<1x128xf32>
    %90 = vector.broadcast %89 : vector<1x128xf32> to vector<8x128xf32>
    %91 = arith.subf %90, %56 : vector<8x128xf32>
    %92 = math.absf %91 : vector<8x128xf32>
    %93 = arith.mulf %92, %33 : vector<8x128xf32>
    %cst_37 = arith.constant dense<0.000000e+00> : vector<8xf32>
    %94 = vector.multi_reduction <add>, %93, %cst_37 [1] : vector<8x128xf32> to vector<8xf32>
    %95 = vector.shape_cast %94 : vector<8xf32> to vector<8x1xf32>
    %96 = vector.broadcast %c2_i32 : i32 to vector<8x128xi32>
    %97 = arith.cmpi eq, %35, %96 : vector<8x128xi32>
    %98 = arith.extui %97 : vector<8x128xi1> to vector<8x128xi32>
    %99 = arith.sitofp %98 : vector<8x128xi32> to vector<8x128xf32>
    %100 = vector.broadcast %95 : vector<8x1xf32> to vector<8x128xf32>
    %101 = arith.mulf %100, %99 : vector<8x128xf32>
    %102 = arith.addf %87, %101 : vector<8x128xf32>
    %c3_i32 = arith.constant 3 : i32
    %103 = arith.index_cast %c3_i32 : i32 to index
    %c0_38 = arith.constant 0 : index
    %104 = vector.load %arg7[%103, %c0_38] : memref<128x128xf32, #tpu.memory_space<vmem>>, vector<1x128xf32>
    %105 = vector.broadcast %104 : vector<1x128xf32> to vector<8x128xf32>
    %106 = arith.subf %105, %56 : vector<8x128xf32>
    %107 = math.absf %106 : vector<8x128xf32>
    %108 = arith.mulf %107, %33 : vector<8x128xf32>
    %cst_39 = arith.constant dense<0.000000e+00> : vector<8xf32>
    %109 = vector.multi_reduction <add>, %108, %cst_39 [1] : vector<8x128xf32> to vector<8xf32>
    %110 = vector.shape_cast %109 : vector<8xf32> to vector<8x1xf32>
    %111 = vector.broadcast %c3_i32 : i32 to vector<8x128xi32>
    %112 = arith.cmpi eq, %35, %111 : vector<8x128xi32>
    %113 = arith.extui %112 : vector<8x128xi1> to vector<8x128xi32>
    %114 = arith.sitofp %113 : vector<8x128xi32> to vector<8x128xf32>
    %115 = vector.broadcast %110 : vector<8x1xf32> to vector<8x128xf32>
    %116 = arith.mulf %115, %114 : vector<8x128xf32>
    %117 = arith.addf %102, %116 : vector<8x128xf32>
    %c4_i32 = arith.constant 4 : i32
    %118 = arith.index_cast %c4_i32 : i32 to index
    %c0_40 = arith.constant 0 : index
    %119 = vector.load %arg7[%118, %c0_40] : memref<128x128xf32, #tpu.memory_space<vmem>>, vector<1x128xf32>
    %120 = vector.broadcast %119 : vector<1x128xf32> to vector<8x128xf32>
    %121 = arith.subf %120, %56 : vector<8x128xf32>
    %122 = math.absf %121 : vector<8x128xf32>
    %123 = arith.mulf %122, %33 : vector<8x128xf32>
    %cst_41 = arith.constant dense<0.000000e+00> : vector<8xf32>
    %124 = vector.multi_reduction <add>, %123, %cst_41 [1] : vector<8x128xf32> to vector<8xf32>
    %125 = vector.shape_cast %124 : vector<8xf32> to vector<8x1xf32>
    %126 = vector.broadcast %c4_i32 : i32 to vector<8x128xi32>
    %127 = arith.cmpi eq, %35, %126 : vector<8x128xi32>
    %128 = arith.extui %127 : vector<8x128xi1> to vector<8x128xi32>
    %129 = arith.sitofp %128 : vector<8x128xi32> to vector<8x128xf32>
    %130 = vector.broadcast %125 : vector<8x1xf32> to vector<8x128xf32>
    %131 = arith.mulf %130, %129 : vector<8x128xf32>
    %132 = arith.addf %117, %131 : vector<8x128xf32>
    %c5_i32 = arith.constant 5 : i32
    %133 = arith.index_cast %c5_i32 : i32 to index
    %c0_42 = arith.constant 0 : index
    %134 = vector.load %arg7[%133, %c0_42] : memref<128x128xf32, #tpu.memory_space<vmem>>, vector<1x128xf32>
    %135 = vector.broadcast %134 : vector<1x128xf32> to vector<8x128xf32>
    %136 = arith.subf %135, %56 : vector<8x128xf32>
    %137 = math.absf %136 : vector<8x128xf32>
    %138 = arith.mulf %137, %33 : vector<8x128xf32>
    %cst_43 = arith.constant dense<0.000000e+00> : vector<8xf32>
    %139 = vector.multi_reduction <add>, %138, %cst_43 [1] : vector<8x128xf32> to vector<8xf32>
    %140 = vector.shape_cast %139 : vector<8xf32> to vector<8x1xf32>
    %141 = vector.broadcast %c5_i32 : i32 to vector<8x128xi32>
    %142 = arith.cmpi eq, %35, %141 : vector<8x128xi32>
    %143 = arith.extui %142 : vector<8x128xi1> to vector<8x128xi32>
    %144 = arith.sitofp %143 : vector<8x128xi32> to vector<8x128xf32>
    %145 = vector.broadcast %140 : vector<8x1xf32> to vector<8x128xf32>
    %146 = arith.mulf %145, %144 : vector<8x128xf32>
    %147 = arith.addf %132, %146 : vector<8x128xf32>
    %c6_i32 = arith.constant 6 : i32
    %148 = arith.index_cast %c6_i32 : i32 to index
    %c0_44 = arith.constant 0 : index
    %149 = vector.load %arg7[%148, %c0_44] : memref<128x128xf32, #tpu.memory_space<vmem>>, vector<1x128xf32>
    %150 = vector.broadcast %149 : vector<1x128xf32> to vector<8x128xf32>
    %151 = arith.subf %150, %56 : vector<8x128xf32>
    %152 = math.absf %151 : vector<8x128xf32>
    %153 = arith.mulf %152, %33 : vector<8x128xf32>
    %cst_45 = arith.constant dense<0.000000e+00> : vector<8xf32>
    %154 = vector.multi_reduction <add>, %153, %cst_45 [1] : vector<8x128xf32> to vector<8xf32>
    %155 = vector.shape_cast %154 : vector<8xf32> to vector<8x1xf32>
    %156 = vector.broadcast %c6_i32 : i32 to vector<8x128xi32>
    %157 = arith.cmpi eq, %35, %156 : vector<8x128xi32>
    %158 = arith.extui %157 : vector<8x128xi1> to vector<8x128xi32>
    %159 = arith.sitofp %158 : vector<8x128xi32> to vector<8x128xf32>
    %160 = vector.broadcast %155 : vector<8x1xf32> to vector<8x128xf32>
    %161 = arith.mulf %160, %159 : vector<8x128xf32>
    %162 = arith.addf %147, %161 : vector<8x128xf32>
    %c7_i32 = arith.constant 7 : i32
    %163 = arith.index_cast %c7_i32 : i32 to index
    %c0_46 = arith.constant 0 : index
    %164 = vector.load %arg7[%163, %c0_46] : memref<128x128xf32, #tpu.memory_space<vmem>>, vector<1x128xf32>
    %165 = vector.broadcast %164 : vector<1x128xf32> to vector<8x128xf32>
    %166 = arith.subf %165, %56 : vector<8x128xf32>
    %167 = math.absf %166 : vector<8x128xf32>
    %168 = arith.mulf %167, %33 : vector<8x128xf32>
    %cst_47 = arith.constant dense<0.000000e+00> : vector<8xf32>
    %169 = vector.multi_reduction <add>, %168, %cst_47 [1] : vector<8x128xf32> to vector<8xf32>
    %170 = vector.shape_cast %169 : vector<8xf32> to vector<8x1xf32>
    %171 = vector.broadcast %c7_i32 : i32 to vector<8x128xi32>
    %172 = arith.cmpi eq, %35, %171 : vector<8x128xi32>
    %173 = arith.extui %172 : vector<8x128xi1> to vector<8x128xi32>
    %174 = arith.sitofp %173 : vector<8x128xi32> to vector<8x128xf32>
    %175 = vector.broadcast %170 : vector<8x1xf32> to vector<8x128xf32>
    %176 = arith.mulf %175, %174 : vector<8x128xf32>
    %177 = arith.addf %162, %176 : vector<8x128xf32>
    %c8_i32 = arith.constant 8 : i32
    %178 = arith.index_cast %c8_i32 : i32 to index
    %c0_48 = arith.constant 0 : index
    %179 = vector.load %arg7[%178, %c0_48] : memref<128x128xf32, #tpu.memory_space<vmem>>, vector<1x128xf32>
    %180 = vector.broadcast %179 : vector<1x128xf32> to vector<8x128xf32>
    %181 = arith.subf %180, %56 : vector<8x128xf32>
    %182 = math.absf %181 : vector<8x128xf32>
    %183 = arith.mulf %182, %33 : vector<8x128xf32>
    %cst_49 = arith.constant dense<0.000000e+00> : vector<8xf32>
    %184 = vector.multi_reduction <add>, %183, %cst_49 [1] : vector<8x128xf32> to vector<8xf32>
    %185 = vector.shape_cast %184 : vector<8xf32> to vector<8x1xf32>
    %186 = vector.broadcast %c8_i32 : i32 to vector<8x128xi32>
    %187 = arith.cmpi eq, %35, %186 : vector<8x128xi32>
    %188 = arith.extui %187 : vector<8x128xi1> to vector<8x128xi32>
    %189 = arith.sitofp %188 : vector<8x128xi32> to vector<8x128xf32>
    %190 = vector.broadcast %185 : vector<8x1xf32> to vector<8x128xf32>
    %191 = arith.mulf %190, %189 : vector<8x128xf32>
    %192 = arith.addf %177, %191 : vector<8x128xf32>
    %c9_i32 = arith.constant 9 : i32
    %193 = arith.index_cast %c9_i32 : i32 to index
    %c0_50 = arith.constant 0 : index
    %194 = vector.load %arg7[%193, %c0_50] : memref<128x128xf32, #tpu.memory_space<vmem>>, vector<1x128xf32>
    %195 = vector.broadcast %194 : vector<1x128xf32> to vector<8x128xf32>
    %196 = arith.subf %195, %56 : vector<8x128xf32>
    %197 = math.absf %196 : vector<8x128xf32>
    %198 = arith.mulf %197, %33 : vector<8x128xf32>
    %cst_51 = arith.constant dense<0.000000e+00> : vector<8xf32>
    %199 = vector.multi_reduction <add>, %198, %cst_51 [1] : vector<8x128xf32> to vector<8xf32>
    %200 = vector.shape_cast %199 : vector<8xf32> to vector<8x1xf32>
    %201 = vector.broadcast %c9_i32 : i32 to vector<8x128xi32>
    %202 = arith.cmpi eq, %35, %201 : vector<8x128xi32>
    %203 = arith.extui %202 : vector<8x128xi1> to vector<8x128xi32>
    %204 = arith.sitofp %203 : vector<8x128xi32> to vector<8x128xf32>
    %205 = vector.broadcast %200 : vector<8x1xf32> to vector<8x128xf32>
    %206 = arith.mulf %205, %204 : vector<8x128xf32>
    %207 = arith.addf %192, %206 : vector<8x128xf32>
    %c10_i32 = arith.constant 10 : i32
    %cst_52 = arith.constant 0.0883883461 : f32
    %208 = vector.broadcast %cst_52 : f32 to vector<8x128xf32>
    %209 = arith.mulf %207, %208 : vector<8x128xf32>
    %210 = arith.addf %54, %209 : vector<8x128xf32>
    %c0_53 = arith.constant 0 : index
    %c0_54 = arith.constant 0 : index
    %211 = vector.load %arg10[%c0_53, %c0_54] : memref<8x128xf32, #tpu.memory_space<vmem>>, vector<8x128xf32>
    tpu.vector_store %arg10[%c0_53, %c0_54], %210 {strides = array<i32>} : memref<8x128xf32, #tpu.memory_space<vmem>>, vector<8x128xf32>,
    return
  }
  func.func @transform_0(%arg0: i32) -> (i32, i32) {
    %c0_i32 = arith.constant 0 : i32
    %c0_i32_0 = arith.constant 0 : i32
    return %arg0, %c0_i32 : i32, i32
  }
  func.func @transform_1(%arg0: i32) -> (i32, i32, i32) {
    %c0_i32 = arith.constant 0 : i32
    %c0_i32_0 = arith.constant 0 : i32
    %c0_i32_1 = arith.constant 0 : i32
    return %c0_i32, %arg0, %c0_i32_0 : i32, i32, i32
  }
  func.func @transform_2(%arg0: i32) -> (i32, i32) {
    %c0_i32 = arith.constant 0 : i32
    %c0_i32_0 = arith.constant 0 : i32
    %c0_i32_1 = arith.constant 0 : i32
    return %c0_i32, %c0_i32_0 : i32, i32
  }
  func.func @transform_3(%arg0: i32) -> (i32, i32) {
    %c0_i32 = arith.constant 0 : i32
    %c0_i32_0 = arith.constant 0 : i32
    %c0_i32_1 = arith.constant 0 : i32
    return %c0_i32, %c0_i32_0 : i32, i32
  }
  func.func @transform_4(%arg0: i32) -> (i32, i32) {
    %c0_i32 = arith.constant 0 : i32
    %c0_i32_0 = arith.constant 0 : i32
    %c0_i32_1 = arith.constant 0 : i32
    return %c0_i32, %c0_i32_0 : i32, i32
  }
  func.func @transform_5(%arg0: i32) -> (i32, i32) {
    %c0_i32 = arith.constant 0 : i32
    %c0_i32_0 = arith.constant 0 : i32
    %c0_i32_1 = arith.constant 0 : i32
    return %c0_i32, %c0_i32_0 : i32, i32
  }
  func.func @transform_6(%arg0: i32) -> (i32, i32) {
    %c0_i32 = arith.constant 0 : i32
    %c0_i32_0 = arith.constant 0 : i32
    %c0_i32_1 = arith.constant 0 : i32
    return %c0_i32, %c0_i32_0 : i32, i32
  }
  func.func @transform_7(%arg0: i32) -> (i32, i32) {
    %c0_i32 = arith.constant 0 : i32
    %c0_i32_0 = arith.constant 0 : i32
    %c0_i32_1 = arith.constant 0 : i32
    return %c0_i32, %c0_i32_0 : i32, i32
  }
  func.func @transform_8(%arg0: i32) -> (i32, i32) {
    %c0_i32 = arith.constant 0 : i32
    %c0_i32_0 = arith.constant 0 : i32
    return %arg0, %c0_i32 : i32, i32
  }
  func.func @transform_9(%arg0: i32) -> (i32, i32) {
    %c0_i32 = arith.constant 0 : i32
    %c0_i32_0 = arith.constant 0 : i32
    return %arg0, %c0_i32 : i32, i32
  }
}

</mosaic_0001>

<bundles_post_ra>
// kernel: tpu_custom_call.1
= control target key start
LH: loop header
LB: loop body
LE: loop exit
PB: predicated region body
PF: predicated region fallthrough
CT: control target
= control target key end

     0   :  { %15 = vsyncpa [#allocation3], 0  ;;  %s1795_s0 = inlined_call_operand.vmem [shape: s32[8,1], index: 0, kind: input, shape index: {}]   ;;  %s1796_s1 = inlined_call_operand.hbm [shape: f32[3,8,128], index: 1, kind: input, shape index: {}]   ;;  %s1797_s2 = inlined_call_operand.hbm [shape: f32[128,128], index: 2, kind: input, shape index: {}]   ;;  %s1798_s3 = inlined_call_operand.hbm [shape: f32[128,128], index: 3, kind: input, shape index: {}]   ;;  %s1799_s4 = inlined_call_operand.vmem [shape: f32[1,128], index: 4, kind: input, shape index: {}]   ;;  %s1800_s5 = inlined_call_operand.hbm [shape: f32[128,128], index: 5, kind: input, shape index: {}]   ;;  %s1801_s6 = inlined_call_operand.hbm [shape: f32[128,128], index: 6, kind: input, shape index: {}]   ;;  %s1802_s7 = inlined_call_operand.vmem [shape: f32[1,128], index: 7, kind: input, shape index: {}]   ;;  %s1803_s8 = inlined_call_operand.hbm [shape: f32[8,128], index: 8, kind: output, shape index: {0}]   ;;  %s1804_s9 = inlined_call_operand.hbm [shape: f32[8,128], index: 9, kind: output, shape index: {1}]  }
   0x1   :  { %16 = vsyncpa [#allocation6], 0 }
   0x2   :  { %17 = vsyncpa [#allocation9], 0 }
   0x3   :  { %18 = vsyncpa [#allocation4], 0 }
   0x4   :  { %19 = vsyncpa [#allocation13], 0  ;;  %s1484_s30 = smov [#allocation5]   ;;  %s1485_s11 = smov [#allocation8]  }
   0x5   :  { %s39_s10 = sshll.u32 %s1484_s30, 4  ;;  %s65_s12 = sshll.u32 %s1485_s11, 4  ;;  %s40_s10 = int_to_ptr.vmem [resolvable:$true] %s39_s10  ;;  %s1548_s12 = int_to_ptr.vmem [resolvable:$true] %s65_s12 }
   0x6   :  { %s1320_s15 = scalar_lea.hbm %s1797_s2, 2048 }
   0x7   :  { %p1321_p0 = scmp.ne.s32.totalorder %s1797_s2, %s1320_s15  ;;  %p1324_p1 = scmp.lt.u32.totalorder %s1320_s15, %s1797_s2 }
   0x9   :  { %p1326_p2 = pnand %p1324_p1, %p1321_p0 }
   0xb   :  { %1329 = shalt.err (!%p1326_p2)
}
   0xc   :  { %s1330_s20 = scalar_lea.vmem %s40_s10, 2048  ;;  %p1335_p4 = scmp.lt.s32.totalorder %s40_s10, %s40_s10 }
   0xd   :  { %p1331_p3 = scmp.ne.s32.totalorder %s40_s10, %s1330_s20  ;;  %p1336_p5 = scmp.lt.s32.totalorder %s1330_s20, %s1330_s20 }
   0xf   :  { %p1337_p6 = por %p1336_p5, %p1335_p4 }
  0x11   :  { %p1338_p7 = pnand %p1337_p6, %p1331_p3 }
  0x13   :  { %1341 = shalt.err (!%p1338_p7)
}
  0x14   :  { %s1486_s21 = smov 128   ;;  %s1487_s22 = smov 8  }
  0x15   :  { %45 = dma.hbm_to_vmem [thread:$0]  %s1797_s2, 2048, %s40_s10, [#allocation6], %s1486_s21, %s1486_s21, %s1487_s22  }
  0x16   :  { %s1342_s27 = scalar_lea.hbm %s1800_s5, 2048 }
  0x17   :  { %p1343_p8 = scmp.ne.s32.totalorder %s1800_s5, %s1342_s27  ;;  %p1346_p9 = scmp.lt.u32.totalorder %s1342_s27, %s1800_s5 }
  0x19   :  { %p1348_p10 = pnand %p1346_p9, %p1343_p8 }
  0x1b   :  { %1351 = shalt.err (!%p1348_p10)
}
  0x1c   :  { %s1352_s13 = scalar_lea.vmem %s1548_s12, 2048  ;;  %p1357_p12 = scmp.lt.s32.totalorder %s1548_s12, %s1548_s12 }
  0x1d   :  { %p1353_p11 = scmp.ne.s32.totalorder %s1548_s12, %s1352_s13  ;;  %p1358_p13 = scmp.lt.s32.totalorder %s1352_s13, %s1352_s13 }
  0x1f   :  { %p1359_p0 = por %p1358_p13, %p1357_p12 }
  0x21   :  { %p1360_p1 = pnand %p1359_p0, %p1353_p11 }
  0x23   :  { %1363 = shalt.err (!%p1360_p1)
}
  0x24   :  { %71 = dma.hbm_to_vmem [thread:$0]  %s1800_s5, 2048, %s1548_s12, [#allocation9], %s1486_s21, %s1486_s21, %s1487_s22  }
  0x25   :  { %s1488_s14 = smov [#allocation2]   ;;  %s1489_s16 = smov [#allocation7]  }
  0x26   :  { %s27_s15 = sshll.u32 %s1488_s14, 4  ;;  %s51_s17 = sshll.u32 %s1489_s16, 4  ;;  %s28_s15 = int_to_ptr.vmem [resolvable:$true] %s27_s15  ;;  %s1585_s17 = int_to_ptr.vmem [resolvable:$true] %s51_s17 }
  0x27   :  { %s1364_s20 = scalar_lea.hbm %s1796_s1, 384 }
  0x28   :  { %p1365_p2 = scmp.ne.s32.totalorder %s1796_s1, %s1364_s20  ;;  %p1368_p3 = scmp.lt.u32.totalorder %s1364_s20, %s1796_s1 }
  0x2a   :  { %p1370_p4 = pnand %p1368_p3, %p1365_p2 }
  0x2c   :  { %1373 = shalt.err (!%p1370_p4)
}
  0x2d   :  { %s1374_s5 = scalar_lea.vmem %s28_s15, 384  ;;  %p1379_p6 = scmp.lt.s32.totalorder %s28_s15, %s28_s15 }
  0x2e   :  { %p1375_p5 = scmp.ne.s32.totalorder %s28_s15, %s1374_s5  ;;  %p1380_p7 = scmp.lt.s32.totalorder %s1374_s5, %s1374_s5 }
  0x30   :  { %p1381_p8 = por %p1380_p7, %p1379_p6 }
  0x32   :  { %p1382_p9 = pnand %p1381_p8, %p1375_p5 }
  0x34   :  { %1385 = shalt.err (!%p1382_p9)
}
  0x35   :  { %33 = dma.hbm_to_vmem [thread:$0]  %s1796_s1, 384, %s28_s15, [#allocation3], %s1486_s21, %s1486_s21, %s1487_s22  }
  0x36   :  { %s1386_s30 = scalar_lea.hbm %s1798_s3, 2048 }
  0x37   :  { %p1387_p10 = scmp.ne.s32.totalorder %s1798_s3, %s1386_s30  ;;  %p1390_p11 = scmp.lt.u32.totalorder %s1386_s30, %s1798_s3 }
  0x39   :  { %p1392_p12 = pnand %p1390_p11, %p1387_p10 }
  0x3b   :  { %1395 = shalt.err (!%p1392_p12)
}
  0x3c   :  { %s1396_s14 = scalar_lea.vmem %s1585_s17, 2048  ;;  %p1401_p0 = scmp.lt.s32.totalorder %s1585_s17, %s1585_s17 }
  0x3d   :  { %p1397_p13 = scmp.ne.s32.totalorder %s1585_s17, %s1396_s14  ;;  %p1402_p1 = scmp.lt.s32.totalorder %s1396_s14, %s1396_s14 }
  0x3f   :  { %p1403_p2 = por %p1402_p1, %p1401_p0 }
  0x41   :  { %p1404_p3 = pnand %p1403_p2, %p1397_p13 }
  0x43   :  { %1407 = shalt.err (!%p1404_p3)
}
  0x44   :  { %57 = dma.hbm_to_vmem [thread:$0]  %s1798_s3, 2048, %s1585_s17, [#allocation6], %s1486_s21, %s1486_s21, %s1487_s22  }
  0x45   :  { %s1490_s16 = smov [#allocation10]   ;;  %s1408_s23 = scalar_lea.hbm %s1801_s6, 2048 }
  0x46   :  { %s77_s18 = sshll.u32 %s1490_s16, 4  ;;  %p1409_p4 = scmp.ne.s32.totalorder %s1801_s6, %s1408_s23  ;;  %s78_s18 = int_to_ptr.vmem [resolvable:$true] %s77_s18 }
  0x47   :  { %p1412_p5 = scmp.lt.u32.totalorder %s1408_s23, %s1801_s6 }
  0x49   :  { %p1414_p6 = pnand %p1412_p5, %p1409_p4 }
  0x4b   :  { %1417 = shalt.err (!%p1414_p6)
}
  0x4c   :  { %s1418_s12 = scalar_lea.vmem %s78_s18, 2048  ;;  %p1423_p8 = scmp.lt.s32.totalorder %s78_s18, %s78_s18 }
  0x4d   :  { %p1419_p7 = scmp.ne.s32.totalorder %s78_s18, %s1418_s12  ;;  %p1424_p9 = scmp.lt.s32.totalorder %s1418_s12, %s1418_s12 }
  0x4f   :  { %p1425_p10 = por %p1424_p9, %p1423_p8 }
  0x51   :  { %p1426_p11 = pnand %p1425_p10, %p1419_p7 }
  0x53   :  { %1429 = shalt.err (!%p1426_p11)
}
  0x54   :  { %83 = dma.hbm_to_vmem [thread:$0]  %s1801_s6, 2048, %s78_s18, [#allocation9], %s1486_s21, %s1486_s21, %s1487_s22  }
  0x55   :  { %1474 = dma.done.wait [#allocation3], 384  }
  0x56   :  { %1475 = vsyncadd [#allocation3], 4294966912 }
  0x57   :  { %1476 = dma.done.wait [#allocation6], 4096  }
  0x58   :  { %1477 = vsyncadd [#allocation6], 4294963200 }
  0x59   :  { %1478 = dma.done.wait [#allocation9], 4096  }
  0x5a   :  { %1479 = vsyncadd [#allocation9], 4294963200  ;;  %v1491_v0 = vmov 0.0|0.0   ;;  %vm1492_vm0 = vmmov 0   ;;  %v1493_v1 = vmov 0.0   ;;  %v1494_v2 = vmov 0  }
  0x5b   :  { %1155 = vmatprep.subr.bf16.mxu0 %v1491_v0  ;;  %1179 = vmatprep.subr.bf16.mxu1 %v1491_v0  ;;  %v109_v3 = vld [vmem:[#allocation5] sm:$0xff]  ;;  %v110_v4 = vld [vmem:[#allocation5 + $0x8] sm:$0xff]  ;;  %v111_v5 = vld [vmem:[#allocation5 + $0x10] sm:$0xff] }
  0x5c   :  { %977 = vmatprep.mubr.msk.f32.mxu0 %vm1492_vm0, %v1493_v1  ;;  %1012 = vmatprep.mubr.msk.f32.mxu1 %vm1492_vm0, %v1493_v1  ;;  %v1643_v6 = vpack.c.bf16 %v110_v4, %v109_v3  ;;  %v112_v7 = vld [vmem:[#allocation5 + $0x18] sm:$0xff]  ;;  %v197_v8 = vld [vmem:[#allocation7] sm:$0xff]  ;;  %v198_v9 = vld [vmem:[#allocation7 + $0x8] sm:$0xff] }
  0x5d   :  { %1313 = vset.pattern.permute.xlu0 %v1494_v2  ;;  %v1180_v10 = vpack.c.bf16 %v198_v9, %v197_v8  ;;  %v199_v11 = vld [vmem:[#allocation7 + $0x10] sm:$0xff]  ;;  %v1646_v12 = vpack.c.bf16 %v112_v7, %v111_v5  ;;  %v200_v13 = vld [vmem:[#allocation7 + $0x18] sm:$0xff]  ;;  %v113_v14 = vld [vmem:[#allocation5 + $0x20] sm:$0xff] }
  0x5e   :  { %1157 = vmatpush3.bf16.msra.mxu0 %v1643_v6  ;;  %v114_v15 = vld [vmem:[#allocation5 + $0x28] sm:$0xff]  ;;  %v1183_v16 = vpack.c.bf16 %v200_v13, %v199_v11  ;;  %v201_v17 = vld [vmem:[#allocation7 + $0x20] sm:$0xff]  ;;  %v115_v20 = vld [vmem:[#allocation5 + $0x30] sm:$0xff] }
  0x5f   :  { %1158 = vmatprep.subr.bf16.mxu0 %v1491_v0  ;;  %1181 = vmatpush3.bf16.msra.mxu1 %v1180_v10  ;;  %v202_v18 = vld [vmem:[#allocation7 + $0x28] sm:$0xff]  ;;  %v1651_v19 = vpack.c.bf16 %v114_v15, %v113_v14  ;;  %v116_v21 = vld [vmem:[#allocation5 + $0x38] sm:$0xff]  ;;  %v203_v23 = vld [vmem:[#allocation7 + $0x30] sm:$0xff] }
  0x60   :  { %1182 = vmatprep.subr.bf16.mxu1 %v1491_v0  ;;  %v1186_v22 = vpack.c.bf16 %v202_v18, %v201_v17  ;;  %v204_v24 = vld [vmem:[#allocation7 + $0x38] sm:$0xff]  ;;  %v1656_v25 = vpack.c.bf16 %v116_v21, %v115_v20  ;;  %v101_v26 = vld [vmem:[%s1795_s0] sm:$0xff]  ;;  %v117_v27 = vld [vmem:[#allocation5 + $0x40] sm:$0xff] }
  0x61   :  { %v118_v28 = vld [vmem:[#allocation5 + $0x48] sm:$0xff]  ;;  %v1189_v29 = vpack.c.bf16 %v204_v24, %v203_v23  ;;  %v205_v30 = vld [vmem:[#allocation7 + $0x40] sm:$0xff]  ;;  %534 = vperm.xlu0 %1313, %v101_v26   ;;  %v119_v33 = vld [vmem:[#allocation5 + $0x50] sm:$0xff] }
  0x62   :  { %1160 = vmatpush3.bf16.msra.mxu0 %v1646_v12  ;;  %v206_v31 = vld [vmem:[#allocation7 + $0x48] sm:$0xff]  ;;  %v1664_v32 = vpack.c.bf16 %v118_v28, %v117_v27  ;;  %v120_v34 = vld [vmem:[#allocation5 + $0x58] sm:$0xff]  ;;  %v207_v36 = vld [vmem:[#allocation7 + $0x50] sm:$0xff] }
  0x63   :  { %1161 = vmatprep.subr.bf16.mxu0 %v1491_v0  ;;  %1184 = vmatpush3.bf16.msra.mxu1 %v1183_v16  ;;  %v1192_v35 = vpack.c.bf16 %v206_v31, %v205_v30  ;;  %v208_v37 = vld [vmem:[#allocation7 + $0x58] sm:$0xff]  ;;  %v1171_v38 = vpack.c.bf16 %v120_v34, %v119_v33  ;;  %v121_v39 = vld [vmem:[#allocation5 + $0x60] sm:$0xff]  ;;  %v122_v40 = vld [vmem:[#allocation5 + $0x68] sm:$0xff] }
  0x64   :  { %1185 = vmatprep.subr.bf16.mxu1 %v1491_v0  ;;  %v1195_v41 = vpack.c.bf16 %v208_v37, %v207_v36  ;;  %v209_v42 = vld [vmem:[#allocation7 + $0x60] sm:$0xff]  ;;  %v210_v43 = vld [vmem:[#allocation7 + $0x68] sm:$0xff]  ;;  %v1174_v44 = vpack.c.bf16 %v122_v40, %v121_v39  ;;  %v123_v45 = vld [vmem:[#allocation5 + $0x70] sm:$0xff] }
  0x65   :  { %v124_v46 = vld [vmem:[#allocation5 + $0x78] sm:$0xff]  ;;  %v1198_v47 = vpack.c.bf16 %v210_v43, %v209_v42  ;;  %v211_v48 = vld [vmem:[#allocation7 + $0x70] sm:$0xff]  ;;  %v366_v56 = vld [vmem:[#allocation8] sm:$0xff] }
  0x66   :  { %1163 = vmatpush3.bf16.msra.mxu0 %v1651_v19  ;;  %v212_v49 = vld [vmem:[#allocation7 + $0x78] sm:$0xff]  ;;  %v1177_v50 = vpack.c.bf16 %v124_v46, %v123_v45  ;;  %v106_v51 = vld [vmem:[#allocation2 + $0x8] sm:$0xff]  ;;  %v367_v57 = vld [vmem:[#allocation8 + $0x8] sm:$0xff] }
  0x67   :  { %1164 = vmatprep.subr.bf16.mxu0 %v1491_v0  ;;  %1187 = vmatpush3.bf16.msra.mxu1 %v1186_v22  ;;  %v108_v52 = vld [vmem:[#allocation2 + $0x10] sm:$0xff]  ;;  %v1201_v53 = vpack.c.bf16 %v212_v49, %v211_v48  ;;  %v1228_v58 = vpack.c.bf16 %v367_v57, %v366_v56  ;;  %v368_v59 = vld [vmem:[#allocation8 + $0x10] sm:$0xff]  ;;  %v370_v62 = vld [vmem:[#allocation8 + $0x20] sm:$0xff]  ;;  %v531_v57 = vlaneseq }
  0x68   :  { %1188 = vmatprep.subr.bf16.mxu1 %v1491_v0  ;;  %v125_v54 = vadd.f32 %v108_v52, %v106_v51  ;;  %v196_v55 = vsub.f32 %v108_v52, %v106_v51  ;;  %v369_v60 = vld [vmem:[#allocation8 + $0x18] sm:$0xff]  ;;  %v371_v63 = vld [vmem:[#allocation8 + $0x28] sm:$0xff]  ;;  %v372_v4 = vld [vmem:[#allocation8 + $0x30] sm:$0xff] }
  0x69   :  { %v1231_v61 = vpack.c.bf16 %v369_v60, %v368_v59  ;;  %v1234_v2 = vpack.c.bf16 %v371_v63, %v370_v62  ;;  %v104_v3 = vld [vmem:[#allocation2] sm:$0xff]  ;;  %v373_v5 = vld [vmem:[#allocation8 + $0x38] sm:$0xff]  ;;  %v374_v7 = vld [vmem:[#allocation8 + $0x40] sm:$0xff]  ;;  %v1495_v63 = vmov 1.0  }
  0x6a   :  { %1166 = vmatpush3.bf16.msra.mxu0 %v1656_v25  ;;  %v375_v8 = vld [vmem:[#allocation8 + $0x48] sm:$0xff]  ;;  %v376_v10 = vld [vmem:[#allocation8 + $0x50] sm:$0xff]  ;;  %v377_v11 = vld [vmem:[#allocation8 + $0x58] sm:$0xff] }
  0x6b   :  { %1167 = vmatprep.subr.bf16.mxu0 %v1491_v0  ;;  %1190 = vmatpush3.bf16.msra.mxu1 %v1189_v29  ;;  %v1240_v9 = vpack.c.bf16 %v375_v8, %v374_v7  ;;  %v378_v13 = vld [vmem:[#allocation8 + $0x60] sm:$0xff]  ;;  %v379_v14 = vld [vmem:[#allocation8 + $0x68] sm:$0xff]  ;;  %v380_v16 = vld [vmem:[#allocation8 + $0x70] sm:$0xff] }
  0x6c   :  { %1191 = vmatprep.subr.bf16.mxu1 %v1491_v0  ;;  %v1246_v15 = vpack.c.bf16 %v379_v14, %v378_v13  ;;  %v381_v17 = vld [vmem:[#allocation8 + $0x78] sm:$0xff]  ;;  %v550_v36 = vld [vmem:[#allocation10 + $0x8] sm:$0xff]  ;;  %v553_v42 = vld [vmem:[#allocation10 + $0x20] sm:$0xff] }
  0x6d   :  { %v1249_v18 = vpack.c.bf16 %v381_v17, %v380_v16  ;;  %v552_v39 = vld [vmem:[#allocation10 + $0x18] sm:$0xff]  ;;  %v554_v43 = vld [vmem:[#allocation10 + $0x28] sm:$0xff]  ;;  %v555_v45 = vld [vmem:[#allocation10 + $0x30] sm:$0xff] }
  0x6e   :  { %1169 = vmatpush3.bf16.msra.mxu0 %v1664_v32  ;;  %v556_v46 = vld [vmem:[#allocation10 + $0x38] sm:$0xff]  ;;  %v557_v48 = vld [vmem:[#allocation10 + $0x40] sm:$0xff]  ;;  %v558_v49 = vld [vmem:[#allocation10 + $0x48] sm:$0xff] }
  0x6f   :  { %1170 = vmatprep.subr.bf16.mxu0 %v1491_v0  ;;  %1193 = vmatpush3.bf16.msra.mxu1 %v1192_v35  ;;  %v549_v35 = vld [vmem:[#allocation10] sm:$0xff]  ;;  %v559_v51 = vld [vmem:[#allocation10 + $0x50] sm:$0xff]  ;;  %v560_v52 = vld [vmem:[#allocation10 + $0x58] sm:$0xff] }
  0x70   :  { %1194 = vmatprep.subr.bf16.mxu1 %v1491_v0  ;;  %v1276_v37 = vpack.c.bf16 %v550_v36, %v549_v35  ;;  %v564_v59 = vld [vmem:[#allocation10 + $0x78] sm:$0xff]  ;;  %v829_v13 = vld [vmem:[#allocation10 + $0x3] ss:$0 sm:$0xff]  ;;  %v831_v14 = vld [vmem:[#allocation10 + $0x4] ss:$0 sm:$0xff] }
  0x71   :  { %v835_v16 = vld [vmem:[#allocation10 + $0x6] ss:$0 sm:$0xff] }
  0x72   :  { %1172 = vmatpush3.bf16.msra.mxu0 %v1171_v38 }
  0x73   :  { %1173 = vmatprep.subr.bf16.mxu0 %v1491_v0  ;;  %1196 = vmatpush3.bf16.msra.mxu1 %v1195_v41 }
  0x74   :  { %1197 = vmatprep.subr.bf16.mxu1 %v1491_v0 }
  0x76   :  { %1175 = vmatpush3.bf16.msra.mxu0 %v1174_v44 }
  0x77   :  { %1176 = vmatprep.subr.bf16.mxu0 %v1491_v0  ;;  %1199 = vmatpush3.bf16.msra.mxu1 %v1198_v47  ;;  %v1285_v47 = vpack.c.bf16 %v556_v46, %v555_v45 }
  0x78   :  { %1200 = vmatprep.subr.bf16.mxu1 %v1491_v0 }
  0x7a   :  { %1178 = vmatpush3.bf16.msra.mxu0 %v1177_v50 }
  0x7b   :  { %1203 = vmatprep.subr.bf16.mxu0 %v1491_v0  ;;  %1202 = vmatpush3.bf16.msra.mxu1 %v1201_v53  ;;  %v1291_v53 = vpack.c.bf16 %v560_v52, %v559_v51 }
  0x7c   :  { %1227 = vmatprep.subr.bf16.mxu1 %v1491_v0 }
  0x7d   :  { %978 = vmatmul.mubr.f32.vlgmr.msra.gmra.mrb[0].mxu0 %v125_v54  ;;  %v561_v54 = vld [vmem:[#allocation10 + $0x60] sm:$0xff] }
  0x7e   :  { %1205 = vmatpush3.bf16.msra.mxu0 %v1643_v6  ;;  %1013 = vmatmul.mubr.f32.vlgmr.msra.gmra.mrb[0].mxu1 %v196_v55  ;;  %v1237_v6 = vpack.c.bf16 %v373_v5, %v372_v4  ;;  %v562_v55 = vld [vmem:[#allocation10 + $0x68] sm:$0xff] }
  0x7f   :  { %1206 = vmatprep.subr.bf16.mxu0 %v1491_v0  ;;  %1047 = vmatprep.mubr.msk.f32.mxu0 %vm1492_vm0, %v1493_v1  ;;  %v1294_v56 = vpack.c.bf16 %v562_v55, %v561_v54 }
  0x80   :  { %1229 = vmatpush3.bf16.msra.mxu1 %v1228_v58  ;;  %1082 = vmatprep.mubr.msk.f32.mxu1 %vm1492_vm0, %v1493_v1 }
  0x81   :  { %1230 = vmatprep.subr.bf16.mxu1 %v1491_v0 }
  0x82   :  { %1208 = vmatpush3.bf16.msra.mxu0 %v1646_v12  ;;  %v1243_v12 = vpack.c.bf16 %v377_v11, %v376_v10  ;;  %v825_v10 = vld [vmem:[#allocation10 + $0x1] ss:$0 sm:$0xff]  ;;  %v841_v11 = vld [vmem:[#allocation10 + $0x9] ss:$0 sm:$0xff] }
  0x83   :  { %1209 = vmatprep.subr.bf16.mxu0 %v1491_v0 }
  0x84   :  { %1232 = vmatpush3.bf16.msra.mxu1 %v1231_v61 }
  0x85   :  { %1233 = vmatprep.subr.bf16.mxu1 %v1491_v0 }
  0x86   :  { %1211 = vmatpush3.bf16.msra.mxu0 %v1651_v19  ;;  %v819_v19 = vld [vmem:[%s1799_s4] ss:$0 sm:$0xff] }
  0x87   :  { %1212 = vmatprep.subr.bf16.mxu0 %v1491_v0 }
  0x88   :  { %1235 = vmatpush3.bf16.msra.mxu1 %v1234_v2 }
  0x89   :  { %1236 = vmatprep.subr.bf16.mxu1 %v1491_v0 }
  0x8a   :  { %1214 = vmatpush3.bf16.msra.mxu0 %v1656_v25 }
  0x8b   :  { %1215 = vmatprep.subr.bf16.mxu0 %v1491_v0 }
  0x8c   :  { %1238 = vmatpush3.bf16.msra.mxu1 %v1237_v6 }
  0x8d   :  { %1239 = vmatprep.subr.bf16.mxu1 %v1491_v0 }
  0x8e   :  { %1217 = vmatpush3.bf16.msra.mxu0 %v1664_v32 }
  0x8f   :  { %1218 = vmatprep.subr.bf16.mxu0 %v1491_v0 }
  0x90   :  { %1241 = vmatpush3.bf16.msra.mxu1 %v1240_v9 }
  0x91   :  { %1242 = vmatprep.subr.bf16.mxu1 %v1491_v0 }
  0x92   :  { %1220 = vmatpush3.bf16.msra.mxu0 %v1171_v38  ;;  %v551_v38 = vld [vmem:[#allocation10 + $0x10] sm:$0xff] }
  0x93   :  { %1221 = vmatprep.subr.bf16.mxu0 %v1491_v0  ;;  %v1279_v41 = vpack.c.bf16 %v552_v39, %v551_v38 }
  0x94   :  { %1244 = vmatpush3.bf16.msra.mxu1 %v1243_v12 }
  0x95   :  { %1245 = vmatprep.subr.bf16.mxu1 %v1491_v0 }
  0x96   :  { %1223 = vmatpush3.bf16.msra.mxu0 %v1174_v44  ;;  %v1282_v44 = vpack.c.bf16 %v554_v43, %v553_v42 }
  0x97   :  { %1224 = vmatprep.subr.bf16.mxu0 %v1491_v0 }
  0x98   :  { %1247 = vmatpush3.bf16.msra.mxu1 %v1246_v15 }
  0x99   :  { %1248 = vmatprep.subr.bf16.mxu1 %v1491_v0 }
  0x9a   :  { %1226 = vmatpush3.bf16.msra.mxu0 %v1177_v50  ;;  %v1288_v50 = vpack.c.bf16 %v558_v49, %v557_v48 }
  0x9b   :  { %1251 = vmatprep.subr.bf16.mxu0 %v1491_v0 }
  0x9c   :  { %1250 = vmatpush3.bf16.msra.mxu1 %v1249_v18 }
  0x9d   :  { %1048 = vmatmul.mubr.f32.vlgmr.msra.gmra.mrb[2].mxu0 %v104_v3  ;;  %1275 = vmatprep.subr.bf16.mxu1 %v1491_v0 }
  0x9e   :  { %1253 = vmatpush3.bf16.msra.mxu0 %v1228_v58  ;;  %1117 = vmatprep.mubr.msk.f32.mxu0 %vm1492_vm0, %v1493_v1  ;;  %v563_v58 = vld [vmem:[#allocation10 + $0x70] sm:$0xff] }
  0x9f   :  { %1254 = vmatprep.subr.bf16.mxu0 %v1491_v0  ;;  %v1297_v60 = vpack.c.bf16 %v564_v59, %v563_v58 }
  0xa2   :  { %1256 = vmatpush3.bf16.msra.mxu0 %v1231_v61  ;;  %v1724_v61 = vand.u32 127, %v531_v57 }
  0xa3   :  { %1257 = vmatprep.subr.bf16.mxu0 %v1491_v0 }
  0xa6   :  { %1259 = vmatpush3.bf16.msra.mxu0 %v1234_v2 }
  0xa7   :  { %1260 = vmatprep.subr.bf16.mxu0 %v1491_v0 }
  0xaa   :  { %1262 = vmatpush3.bf16.msra.mxu0 %v1237_v6  ;;  %v1735_v6 = vld [vmem:[%s1802_s7] ss:$0 sm:$0xff]  ;;  %s1496_s7 = smov [#allocation11]  }
  0xab   :  { %1263 = vmatprep.subr.bf16.mxu0 %v1491_v0  ;;  %s794_s28 = sshll.u32 %s1496_s7, 4  ;;  %s795_s28 = int_to_ptr.vmem [resolvable:$true] %s794_s28 }
  0xac   :  { %s1430_s29 = scalar_lea.vmem %s795_s28, 128  ;;  %p1435_p13 = scmp.lt.s32.totalorder %s795_s28, %s795_s28 }
  0xad   :  { %p1431_p12 = scmp.ne.s32.totalorder %s795_s28, %s1430_s29  ;;  %p1436_p0 = scmp.lt.s32.totalorder %s1430_s29, %s1430_s29 }
  0xae   :  { %1265 = vmatpush3.bf16.msra.mxu0 %v1240_v9  ;;  %v823_v9 = vld [vmem:[#allocation10] ss:$0 sm:$0xff] }
  0xaf   :  { %1266 = vmatprep.subr.bf16.mxu0 %v1491_v0  ;;  %p1437_p1 = por %p1436_p0, %p1435_p13 }
  0xb1   :  { %p1438_p2 = pnand %p1437_p1, %p1431_p12 }
  0xb2   :  { %1268 = vmatpush3.bf16.msra.mxu0 %v1243_v12  ;;  %v827_v12 = vld [vmem:[#allocation10 + $0x2] ss:$0 sm:$0xff] }
  0xb3   :  { %1269 = vmatprep.subr.bf16.mxu0 %v1491_v0 }
  0xb6   :  { %1271 = vmatpush3.bf16.msra.mxu0 %v1246_v15  ;;  %v833_v15 = vld [vmem:[#allocation10 + $0x5] ss:$0 sm:$0xff] }
  0xb7   :  { %1272 = vmatprep.subr.bf16.mxu0 %v1491_v0 }
  0xba   :  { %1274 = vmatpush3.bf16.msra.mxu0 %v1249_v18  ;;  %v837_v18 = vld [vmem:[#allocation10 + $0x7] ss:$0 sm:$0xff] }
  0xe0   :  { %v535_v62 = vpop.permute.xlu0 %534 }
  0xe1   :  { %vm536_vm1 = vcmp.eq.s32.totalorder %v535_v62, %v1724_v61 }
  0xe2   :  { %v821_v3 = vsel %vm536_vm1, 1.0, %v1493_v1 }
  0xe3   :  { %v542_v52 = vmul.f32 %v821_v3, %v1735_v6 }
 0x150   :  { %v192_v20 = vpop.f32.mrb[0].mxu0 }
 0x151   :  { %v360_v21 = vmul.f32 0.5, %v192_v20  ;;  %v979_v22 = vpop.f32.mrb[1].mxu0  ;;  %v279_v23 = vpop.f32.mrb[0].mxu1 }
 0x152   :  { %v1014_v24 = vpop.f32.mrb[1].mxu1 }
 0x153   :  { %v361_v25 = vadd.f32 %v819_v19, %v360_v21  ;;  %v839_v24 = vld [vmem:[#allocation10 + $0x8] ss:$0 sm:$0xff] }
 0x155   :  { %v362_v26 = vsub.f32 %v361_v25, %v279_v23  ;;  %v364_v27 = vadd.f32 %v361_v25, %v279_v23 }
 0x157   :  { %1314 = vtanh.f32 %v362_v26 }
 0x158   :  { %1316 = vtanh.f32 %v364_v27 }
 0x161   :  { %v1315_v28 = vpop.eup %1314 }
 0x162   :  { %v1317_v29 = vpop.eup %1316 }
 0x163   :  { %v1714_v30 = vsub.f32 %v1317_v29, %v1315_v28  ;;  %v459_v31 = vadd.f32 %v1317_v29, %v1315_v28 }
 0x165   :  { %1118 = vmatmul.mubr.f32.vlgmr.msra.gmra.mrb[4].mxu0 %v459_v31 }
 0x170   :  { %v355_v32 = vpop.f32.mrb[2].mxu0 }
 0x171   :  { %v356_v33 = vadd.f32 %v819_v19, %v355_v32  ;;  %v1049_v34 = vpop.f32.mrb[3].mxu0 }
 0x173   :  { %1318 = vtanh.f32 %v356_v33 }
 0x17d   :  { %v1319_v40 = vpop.eup %1318 }
 0x17e   :  { %1083 = vmatmul.mubr.f32.vlgmr.msra.gmra.mrb[2].mxu1 %v1319_v40 }
 0x17f   :  { %1277 = vmatpush3.bf16.msra.mxu1 %v1276_v37  ;;  %1152 = vmatprep.mubr.msk.f32.mxu1 %vm1492_vm0, %v1493_v1 }
 0x180   :  { %1278 = vmatprep.subr.bf16.mxu1 %v1491_v0 }
 0x183   :  { %1280 = vmatpush3.bf16.msra.mxu1 %v1279_v41 }
 0x184   :  { %1281 = vmatprep.subr.bf16.mxu1 %v1491_v0 }
 0x187   :  { %1283 = vmatpush3.bf16.msra.mxu1 %v1282_v44 }
 0x188   :  { %1284 = vmatprep.subr.bf16.mxu1 %v1491_v0 }
 0x18b   :  { %1286 = vmatpush3.bf16.msra.mxu1 %v1285_v47 }
 0x18c   :  { %1287 = vmatprep.subr.bf16.mxu1 %v1491_v0 }
 0x18f   :  { %1289 = vmatpush3.bf16.msra.mxu1 %v1288_v50 }
 0x190   :  { %1290 = vmatprep.subr.bf16.mxu1 %v1491_v0 }
 0x193   :  { %1292 = vmatpush3.bf16.msra.mxu1 %v1291_v53 }
 0x194   :  { %1293 = vmatprep.subr.bf16.mxu1 %v1491_v0 }
 0x197   :  { %1295 = vmatpush3.bf16.msra.mxu1 %v1294_v56 }
 0x198   :  { %1296 = vmatprep.subr.bf16.mxu1 %v1491_v0 }
 0x19b   :  { %1298 = vmatpush3.bf16.msra.mxu1 %v1297_v60 }
 0x19e   :  { %1153 = vmatmul.mubr.msk.f32.vlgmr.msra.gmra.mrb[4].mxu1 %vm536_vm1, %v1495_v63 }
 0x238   :  { %v1728_v2 = vpop.f32.mrb[4].mxu0 }
 0x239   :  { %v1119_v4 = vpop.f32.mrb[5].mxu0  ;;  %v539_v5 = vmul.f32 %v821_v3, %v1728_v2 }
 0x23b   :  { %540 = vadd.xlane.f32.xlu1 %v539_v5 }
 0x251   :  { %v454_v0 = vpop.f32.mrb[2].mxu1 }
 0x252   :  { %v455_v7 = vadd.f32 %v1735_v6, %v454_v0  ;;  %v1084_v8 = vpop.f32.mrb[3].mxu1 }
 0x254   :  { %458 = vst [vmem:[#allocation11] sm:$0xff] %v455_v7 }
 0x271   :  { %v631_v17 = vpop.f32.mrb[4].mxu1 }
 0x272   :  { %v1154_v19 = vpop.f32.mrb[5].mxu1  ;;  %v640_v20 = vsub.f32 %v823_v9, %v631_v17  ;;  %v655_v21 = vsub.f32 %v825_v10, %v631_v17  ;;  %v775_v22 = vsub.f32 %v841_v11, %v631_v17  ;;  %v670_v23 = vsub.f32 %v827_v12, %v631_v17 }
 0x273   :  { %v685_v25 = vsub.f32 %v829_v13, %v631_v17  ;;  %v700_v26 = vsub.f32 %v831_v14, %v631_v17  ;;  %v715_v27 = vsub.f32 %v833_v15, %v631_v17  ;;  %v730_v28 = vsub.f32 %v835_v16, %v631_v17 }
 0x274   :  { %v641_v29 = vand.u32 2147483647, %v640_v20  ;;  %v656_v31 = vand.u32 2147483647, %v655_v21  ;;  %v776_v32 = vand.u32 2147483647, %v775_v22  ;;  %v745_v33 = vsub.f32 %v837_v18, %v631_v17 }
 0x275   :  { %v671_v34 = vand.u32 2147483647, %v670_v23  ;;  %v686_v35 = vand.u32 2147483647, %v685_v25  ;;  %v701_v36 = vand.u32 2147483647, %v700_v26  ;;  %v760_v37 = vsub.f32 %v839_v24, %v631_v17 }
 0x276   :  { %v642_v38 = vmul.f32 %v641_v29, %v1714_v30  ;;  %v657_v39 = vmul.f32 %v656_v31, %v1714_v30  ;;  %v777_v40 = vmul.f32 %v776_v32, %v1714_v30  ;;  %v716_v41 = vand.u32 2147483647, %v715_v27 }
 0x277   :  { %v672_v42 = vmul.f32 %v671_v34, %v1714_v30  ;;  %v687_v43 = vmul.f32 %v686_v35, %v1714_v30  ;;  %v702_v44 = vmul.f32 %v701_v36, %v1714_v30  ;;  %v731_v45 = vand.u32 2147483647, %v730_v28 }
 0x278   :  { %643 = vadd.xlane.f32.xlu0 %v642_v38  ;;  %658 = vadd.xlane.f32.xlu1 %v657_v39  ;;  %v717_v46 = vmul.f32 %v716_v41, %v1714_v30  ;;  %v746_v47 = vand.u32 2147483647, %v745_v33  ;;  %v761_v48 = vand.u32 2147483647, %v760_v37 }
 0x279   :  { %v732_v49 = vmul.f32 %v731_v45, %v1714_v30 }
 0x27a   :  { %v747_v50 = vmul.f32 %v746_v47, %v1714_v30  ;;  %v762_v51 = vmul.f32 %v761_v48, %v1714_v30 }
 0x27c   :  { %778 = vadd.xlane.f32.xlu0 %v777_v40  ;;  %673 = vadd.xlane.f32.xlu1 %v672_v42 }
 0x280   :  { %688 = vadd.xlane.f32.xlu1 %v687_v43 }
 0x284   :  { %703 = vadd.xlane.f32.xlu1 %v702_v44 }
 0x288   :  { %718 = vadd.xlane.f32.xlu1 %v717_v46 }
 0x28c   :  { %733 = vadd.xlane.f32.xlu1 %v732_v49 }
 0x290   :  { %748 = vadd.xlane.f32.xlu1 %v747_v50 }
 0x294   :  { %763 = vadd.xlane.f32.xlu1 %v762_v51 }
 0x298   :  { %543 = vadd.xlane.f32.xlu1 %v542_v52 }
 0x299   :  { %1441 = shalt.err (!%p1438_p2)
}
 0x29a   :  { %s1442_s13 = scalar_lea.hbm %s1803_s8, 128 }
 0x29b   :  { %p1443_p3 = scmp.ne.s32.totalorder %s1803_s8, %s1442_s13  ;;  %p1446_p4 = scmp.lt.u32.totalorder %s1442_s13, %s1803_s8 }
 0x29d   :  { %p1448_p5 = pnand %p1446_p4, %p1443_p3 }
 0x29f   :  { %1451 = shalt.err (!%p1448_p5)
}
 0x2a0   :  { %797 = dma.vmem_to_hbm [thread:$0]  %s795_s28, 128, %s1803_s8, [#allocation4]   ;;  %vm645_vm2 = vcmp.eq.s32.totalorder %v1724_v61, 0  ;;  %vm660_vm3 = vcmp.eq.s32.totalorder %v1724_v61, 1  ;;  %vm675_vm4 = vcmp.eq.s32.totalorder %v1724_v61, 2  ;;  %vm690_vm5 = vcmp.eq.s32.totalorder %v1724_v61, 3 }
 0x2a1   :  { %v824_v56 = vsel %vm645_vm2, 1.0, %v1493_v1  ;;  %v826_v58 = vsel %vm660_vm3, 1.0, %v1493_v1  ;;  %v828_v59 = vsel %vm675_vm4, 1.0, %v1493_v1  ;;  %vm705_vm6 = vcmp.eq.s32.totalorder %v1724_v61, 4  ;;  %s1497_s8 = smov [#allocation12]  }
 0x2a2   :  { %v830_v3 = vsel %vm690_vm5, 1.0, %v1493_v1  ;;  %vm720_vm7 = vcmp.eq.s32.totalorder %v1724_v61, 5  ;;  %v832_v5 = vsel %vm705_vm6, 1.0, %v1493_v1  ;;  %vm735_vm8 = vcmp.eq.s32.totalorder %v1724_v61, 6  ;;  %s804_s18 = sshll.u32 %s1497_s8, 4  ;;  %s805_s18 = int_to_ptr.vmem [resolvable:$true] %s804_s18 }
 0x2a3   :  { %v834_v9 = vsel %vm720_vm7, 1.0, %v1493_v1  ;;  %vm750_vm9 = vcmp.eq.s32.totalorder %v1724_v61, 7  ;;  %v836_v12 = vsel %vm735_vm8, 1.0, %v1493_v1  ;;  %vm765_vm10 = vcmp.eq.s32.totalorder %v1724_v61, 8  ;;  %s1452_s19 = scalar_lea.vmem %s805_s18, 128  ;;  %p1457_p7 = scmp.lt.s32.totalorder %s805_s18, %s805_s18 }
 0x2a4   :  { %v838_v16 = vsel %vm750_vm9, 1.0, %v1493_v1  ;;  %vm780_vm11 = vcmp.eq.s32.totalorder %v1724_v61, 9  ;;  %v840_v22 = vsel %vm765_vm10, 1.0, %v1493_v1  ;;  %p1453_p6 = scmp.ne.s32.totalorder %s805_s18, %s1452_s19  ;;  %p1458_p8 = scmp.lt.s32.totalorder %s1452_s19, %s1452_s19 }
 0x2a5   :  { %v842_v24 = vsel %vm780_vm11, 1.0, %v1493_v1 }
 0x2a6   :  { %p1459_p9 = por %p1458_p8, %p1457_p7 }
 0x2a8   :  { %p1460_p10 = pnand %p1459_p9, %p1453_p6 }
 0x2c8   :  { %v541_v30 = vpop.xlane.xlu1 %540 }
 0x2c9   :  { %v545_v27 = vsub.f32 %v1728_v2, %v541_v30 }
 0x2cb   :  { %v546_v34 = vmul.f32 0.5, %v545_v27 }
 0x305   :  { %v659_v53 = vpop.xlane.xlu1 %658  ;;  %v644_v57 = vpop.xlane.xlu0 %643 }
 0x306   :  { %v648_v62 = vmul.f32 %v824_v56, %v644_v57  ;;  %v663_v63 = vmul.f32 %v826_v58, %v659_v53 }
 0x308   :  { %v664_v7 = vadd.f32 %v663_v63, %v648_v62 }
 0x309   :  { %v674_v54 = vpop.xlane.xlu1 %673  ;;  %v779_v25 = vpop.xlane.xlu0 %778 }
 0x30a   :  { %v678_v4 = vmul.f32 %v828_v59, %v674_v54  ;;  %v783_v31 = vmul.f32 %v842_v24, %v779_v25 }
 0x30c   :  { %v679_v10 = vadd.f32 %v678_v4, %v664_v7 }
 0x30d   :  { %v689_v55 = vpop.xlane.xlu1 %688 }
 0x30e   :  { %v693_v8 = vmul.f32 %v830_v3, %v689_v55 }
 0x310   :  { %v694_v14 = vadd.f32 %v693_v8, %v679_v10 }
 0x311   :  { %v704_v60 = vpop.xlane.xlu1 %703 }
 0x312   :  { %v708_v11 = vmul.f32 %v832_v5, %v704_v60 }
 0x314   :  { %v709_v17 = vadd.f32 %v708_v11, %v694_v14 }
 0x315   :  { %v719_v0 = vpop.xlane.xlu1 %718 }
 0x316   :  { %v723_v15 = vmul.f32 %v834_v9, %v719_v0 }
 0x318   :  { %v724_v20 = vadd.f32 %v723_v15, %v709_v17 }
 0x319   :  { %v734_v13 = vpop.xlane.xlu1 %733 }
 0x31a   :  { %v738_v18 = vmul.f32 %v836_v12, %v734_v13 }
 0x31c   :  { %v739_v23 = vadd.f32 %v738_v18, %v724_v20 }
 0x31d   :  { %v749_v19 = vpop.xlane.xlu1 %748 }
 0x31e   :  { %v753_v21 = vmul.f32 %v838_v16, %v749_v19 }
 0x320   :  { %v754_v28 = vadd.f32 %v753_v21, %v739_v23 }
 0x321   :  { %v764_v26 = vpop.xlane.xlu1 %763 }
 0x322   :  { %v768_v29 = vmul.f32 %v840_v22, %v764_v26 }
 0x324   :  { %v769_v32 = vadd.f32 %v768_v29, %v754_v28 }
 0x325   :  { %v544_v33 = vpop.xlane.xlu1 %543 }
 0x326   :  { %v784_v35 = vadd.f32 %v783_v31, %v769_v32  ;;  %v547_v61 = vsub.f32 %v1735_v6, %v544_v33 }
 0x328   :  { %v785_v36 = vmul.f32 0.088388346, %v784_v35  ;;  %v548_v37 = vadd.f32 %v547_v61, %v546_v34 }
 0x32a   :  { %v786_v38 = vadd.f32 %v785_v36, %v548_v37 }
 0x32c   :  { %787 = vst [vmem:[#allocation12] sm:$0xff] %v786_v38 }
 0x32d   :  { %1463 = shalt.err (!%p1460_p10)
}
 0x32e   :  { %s1464_s24 = scalar_lea.hbm %s1804_s9, 128 }
 0x32f   :  { %p1465_p11 = scmp.ne.s32.totalorder %s1804_s9, %s1464_s24  ;;  %p1468_p12 = scmp.lt.u32.totalorder %s1464_s24, %s1804_s9 }
 0x331   :  { %p1470_p13 = pnand %p1468_p12, %p1465_p11 }
 0x333   :  { %1473 = shalt.err (!%p1470_p13)
}
 0x334   :  { %807 = dma.vmem_to_hbm [thread:$0]  %s805_s18, 128, %s1804_s9, [#allocation13]  }
 0x335   :  { %1480 = dma.done.wait [#allocation4], 128  }
 0x336   :  { %1481 = vsyncadd [#allocation4], 4294967168 }
 0x337   :  { %1482 = dma.done.wait [#allocation13], 128  }
 0x338   :  { %1483 = vsyncadd [#allocation13], 4294967168 }
 0x339   :  { %814 = vsyncpa [#allocation3], 1 }
 0x33a   :  { %815 = vsyncpa [#allocation6], 1 }
 0x33b   :  { %816 = vsyncpa [#allocation9], 1 }
 0x33c   :  { %817 = vsyncpa [#allocation4], 1 }
 0x33d   :  { %818 = vsyncpa [#allocation13], 1 }

</bundles_post_ra>
